<compile_context>
chip_gen: v7x
topology: tpu7x:2x2x1
jax: 0.10.0
libtpu: 0.0.40
codegen_flags: <defaults>
</compile_context>

<pallas_src>
import functools

import jax
import jax.numpy as jnp
from jax.experimental import pallas as pl
from jax.experimental.pallas import tpu as pltpu

HIDDEN = 24  # fixed by the module definition


def _round_up(n, m):
    return ((n + m - 1) // m) * m


def _mlp_argmax_kernel(x_ref, w1_ref, b1_ref, w2_ref, b2_ref, out_ref):
    x = x_ref[...]  # (tb, C_in) -- batch on sublanes as stored in HBM

    # h^T = W1 @ x^T  -> (HIDDEN, tb): NT contraction puts batch on lanes.
    h_t = jax.lax.dot_general(
        w1_ref[...], x, (((1,), (1,)), ((), ())),
        preferred_element_type=jnp.float32)
    h_t = jnp.maximum(h_t + b1_ref[...], 0.0)  # dense (HIDDEN, tb) vregs

    # logits^T = W2 @ h^T -> (n_out, tb)
    logits_t = jnp.dot(w2_ref[...], h_t,
                       preferred_element_type=jnp.float32) + b2_ref[...]

    # softmax is argmax-invariant -> argmax directly over the class axis
    # (sublanes).  First-maximal-index tie-break, matching torch.argmax,
    # expressed with max-reductions only (negate index, take max).
    n_cls = logits_t.shape[0]
    m = jnp.max(logits_t, axis=0, keepdims=True)                      # (1, tb)
    cls = jax.lax.broadcasted_iota(jnp.int32, logits_t.shape, 0)
    cls = cls.astype(jnp.float32)
    neg_best = jnp.max(jnp.where(logits_t == m, -cls, float(-n_cls)),
                       axis=0, keepdims=True)                         # (1, tb)
    out_ref[...] = (-neg_best).astype(jnp.int32)  # lane-dense int32 row


def prepare_params(w1, b1, w2, b2):
    """One-time preprocessing (off the hot path).

    torch's Linear stores W as [out_features, in_features], which is exactly
    the layout the transposed (batch-on-lanes) compute wants, so weights are
    passed through untouched; biases become column vectors that broadcast
    along the lane (batch) axis.
    """
    return (
        w1,                    # [24, C_in]
        b1.reshape(-1, 1),     # [24, 1]
        w2,                    # [out, 24]
        b2.reshape(-1, 1),     # [out, 1]
    )


@functools.partial(jax.jit, static_argnames=("tile_b",))
def simple_forward(x, params, tile_b=2048):
    """x: [B, C_in] f32; params = prepare_params(w1, b1, w2, b2).
    Returns int32 [B] of argmax class indices."""
    w1, b1_c, w2, b2_c = params
    B, c_in = x.shape
    n_out = w2.shape[0]

    # Batch tile: multiple of 128 (lane width).  Force >= 2 grid steps when
    # the batch allows so both v7x TensorCores get work and the pipeline
    # actually double-buffers; padding waste is bounded by < 1 tile.
    tile_b = _round_up(max(int(tile_b), 128), 128)
    b128 = _round_up(B, 128)
    tb = min(tile_b, b128)
    if b128 >= 2 * 128:
        tb = min(tb, _round_up(pl.cdiv(b128, 2), 128))
    b_pad = _round_up(B, tb)
    if b_pad != B:
        x = jnp.pad(x, ((0, b_pad - B), (0, 0)))

    grid = (b_pad // tb,)
    flops = 2 * b_pad * (c_in * HIDDEN + HIDDEN * n_out)
    bytes_accessed = (
        b_pad * (c_in * 4 + 4)
        + 4 * (w1.size + b1_c.size + w2.size + b2_c.size)
    )

    out = pl.pallas_call(
        _mlp_argmax_kernel,
        out_shape=jax.ShapeDtypeStruct((1, b_pad), jnp.int32),
        grid=grid,
        in_specs=[
            pl.BlockSpec((tb, c_in), lambda i: (i, 0)),       # x tile (pipelined)
            pl.BlockSpec((HIDDEN, c_in), lambda i: (0, 0)),   # W1   (resident)
            pl.BlockSpec((HIDDEN, 1), lambda i: (0, 0)),      # b1   (resident)
            pl.BlockSpec((n_out, HIDDEN), lambda i: (0, 0)),  # W2   (resident)
            pl.BlockSpec((n_out, 1), lambda i: (0, 0)),       # b2   (resident)
        ],
        out_specs=pl.BlockSpec((1, tb), lambda i: (0, i)),    # lane-dense int32
        compiler_params=pltpu.CompilerParams(
            dimension_semantics=("parallel",),
        ),
        cost_estimate=pl.CostEstimate(
            flops=flops, transcendentals=0, bytes_accessed=bytes_accessed
        ),
    )(x, w1, b1_c, w2, b2_c)
    return out[0, :B]


def _init_params(key, in_channels, out_classes):
    # Deterministic synthetic init (uniform like torch's default Linear init).
    k1, k2, k3, k4 = jax.random.split(key, 4)
    lim1 = 1.0 / jnp.sqrt(in_channels)
    lim2 = 1.0 / jnp.sqrt(float(HIDDEN))
    w1 = jax.random.uniform(k1, (HIDDEN, in_channels), jnp.float32, -lim1, lim1)
    b1 = jax.random.uniform(k2, (HIDDEN,), jnp.float32, -lim1, lim1)
    w2 = jax.random.uniform(k3, (out_classes, HIDDEN), jnp.float32, -lim2, lim2)
    b2 = jax.random.uniform(k4, (out_classes,), jnp.float32, -lim2, lim2)
    return w1, b1, w2, b2


if __name__ == "__main__":
    in_channels, out_classes, batch = 32, 10, 8
    key = jax.random.PRNGKey(0)
    kx, kp = jax.random.split(key)
    x = jax.random.normal(kx, (batch, in_channels), jnp.float32)
    w1, b1, w2, b2 = _init_params(kp, in_channels, out_classes)

    params = prepare_params(w1, b1, w2, b2)   # one-time, off the hot path
    y = simple_forward(x, params)
    jax.block_until_ready(y)

    # Sanity check against a plain-JAX reference of the torch module.
    h_ref = jnp.maximum(x @ w1.T + b1, 0.0)
    logits_ref = h_ref @ w2.T + b2
    y_ref = jnp.argmax(jax.nn.softmax(logits_ref, axis=-1), axis=-1).astype(jnp.int32)
    assert y.shape == (batch,) and y.dtype == jnp.int32
    assert bool(jnp.all(y == y_ref))
    print("KERNEL_OK")
</pallas_src>

<mosaic_0001>
module attributes {stable_mosaic.version = 11 : i64} {
  func.func @_mlp_argmax_kernel(%arg0: i32, %arg1: memref<128x32xf32, #tpu.memory_space<vmem>>, %arg2: memref<24x32xf32, #tpu.memory_space<vmem>>, %arg3: memref<24x1xf32, #tpu.memory_space<vmem>>, %arg4: memref<10x24xf32, #tpu.memory_space<vmem>>, %arg5: memref<10x1xf32, #tpu.memory_space<vmem>>, %arg6: memref<1x128xi32, #tpu.memory_space<vmem>>) attributes {dimension_semantics = [#tpu.dimension_semantics<parallel>], iteration_bounds = array<i64: 1>, scalar_prefetch = 0 : i64, scratch_operands = 0 : i64, tpu.core_type = #tpu.core_type<tc>, window_params = [{transform_indices = @transform_0, window_bounds = array<i64: 128, 32>}, {pipeline_mode = #tpu.pipeline_mode<synchronous>, transform_indices = @transform_1, window_bounds = array<i64: 24, 32>}, {pipeline_mode = #tpu.pipeline_mode<synchronous>, transform_indices = @transform_2, window_bounds = array<i64: 24, 1>}, {pipeline_mode = #tpu.pipeline_mode<synchronous>, transform_indices = @transform_3, window_bounds = array<i64: 10, 24>}, {pipeline_mode = #tpu.pipeline_mode<synchronous>, transform_indices = @transform_4, window_bounds = array<i64: 10, 1>}, {transform_indices = @transform_5, window_bounds = array<i64: 1, 128>}]} {
    %c0 = arith.constant 0 : index
    %c0_0 = arith.constant 0 : index
    %0 = vector.load %arg1[%c0, %c0_0] : memref<128x32xf32, #tpu.memory_space<vmem>>, vector<128x32xf32>
    %c0_1 = arith.constant 0 : index
    %c0_2 = arith.constant 0 : index
    %1 = vector.load %arg2[%c0_1, %c0_2] : memref<24x32xf32, #tpu.memory_space<vmem>>, vector<24x32xf32>
    %cst = arith.constant dense<0.000000e+00> : vector<24x128xf32>
    %2 = tpu.matmul %1, %0, %cst {dimension_numbers = #tpu.dot_dimension_numbers<[1], [1], [0], [0], [0, 0, 1, 0], [], []>} : vector<24x32xf32>, vector<128x32xf32>, vector<24x128xf32> -> vector<24x128xf32>
    %c0_3 = arith.constant 0 : index
    %c0_4 = arith.constant 0 : index
    %3 = vector.load %arg3[%c0_3, %c0_4] : memref<24x1xf32, #tpu.memory_space<vmem>>, vector<24x1xf32>
    %4 = vector.broadcast %3 : vector<24x1xf32> to vector<24x128xf32>
    %5 = arith.addf %2, %4 : vector<24x128xf32>
    %cst_5 = arith.constant 0.000000e+00 : f32
    %6 = vector.broadcast %cst_5 : f32 to vector<24x128xf32>
    %7 = arith.maximumf %5, %6 : vector<24x128xf32>
    %c0_6 = arith.constant 0 : index
    %c0_7 = arith.constant 0 : index
    %8 = vector.load %arg4[%c0_6, %c0_7] : memref<10x24xf32, #tpu.memory_space<vmem>>, vector<10x24xf32>
    %cst_8 = arith.constant dense<0.000000e+00> : vector<10x128xf32>
    %9 = tpu.matmul %8, %7, %cst_8 {dimension_numbers = #tpu.dot_dimension_numbers<[1], [0], [0], [1], [0, 0, 1, 1], [], []>} : vector<10x24xf32>, vector<24x128xf32>, vector<10x128xf32> -> vector<10x128xf32>
    %c0_9 = arith.constant 0 : index
    %c0_10 = arith.constant 0 : index
    %10 = vector.load %arg5[%c0_9, %c0_10] : memref<10x1xf32, #tpu.memory_space<vmem>>, vector<10x1xf32>
    %11 = vector.broadcast %10 : vector<10x1xf32> to vector<10x128xf32>
    %12 = arith.addf %9, %11 : vector<10x128xf32>
    %cst_11 = arith.constant dense<0xFF800000> : vector<128xf32>
    %13 = vector.multi_reduction <maximumf>, %12, %cst_11 [0] : vector<10x128xf32> to vector<128xf32>
    %14 = vector.shape_cast %13 : vector<128xf32> to vector<1x128xf32>
    %15 = tpu.iota {dimensions = array<i32: 0>} : vector<10x128xi32>
    %16 = arith.sitofp %15 : vector<10x128xi32> to vector<10x128xf32>
    %17 = vector.broadcast %14 : vector<1x128xf32> to vector<10x128xf32>
    %18 = arith.cmpf oeq, %12, %17 : vector<10x128xf32>
    %cst_12 = arith.constant 0.000000e+00 : f32
    %19 = vector.broadcast %cst_12 : f32 to vector<10x128xf32>
    %20 = arith.subf %19, %16 : vector<10x128xf32>
    %cst_13 = arith.constant -1.000000e+01 : f32
    %21 = vector.broadcast %cst_13 : f32 to vector<10x128xf32>
    %22 = arith.select %18, %20, %21 : vector<10x128xi1>, vector<10x128xf32>
    %cst_14 = arith.constant dense<0xFF800000> : vector<128xf32>
    %23 = vector.multi_reduction <maximumf>, %22, %cst_14 [0] : vector<10x128xf32> to vector<128xf32>
    %24 = vector.shape_cast %23 : vector<128xf32> to vector<1x128xf32>
    %cst_15 = arith.constant 0.000000e+00 : f32
    %25 = vector.broadcast %cst_15 : f32 to vector<1x128xf32>
    %26 = arith.subf %25, %24 : vector<1x128xf32>
    %27 = arith.fptosi %26 : vector<1x128xf32> to vector<1x128xi32>
    %c0_16 = arith.constant 0 : index
    %c0_17 = arith.constant 0 : index
    %28 = vector.load %arg6[%c0_16, %c0_17] : memref<1x128xi32, #tpu.memory_space<vmem>>, vector<1x128xi32>
    tpu.vector_store %arg6[%c0_16, %c0_17], %27 {strides = array<i32>} : memref<1x128xi32, #tpu.memory_space<vmem>>, vector<1x128xi32>,
    return
  }
  func.func @transform_0(%arg0: i32) -> (i32, i32) {
    %c0_i32 = arith.constant 0 : i32
    %c0_i32_0 = arith.constant 0 : i32
    return %arg0, %c0_i32 : i32, i32
  }
  func.func @transform_1(%arg0: i32) -> (i32, i32) {
    %c0_i32 = arith.constant 0 : i32
    %c0_i32_0 = arith.constant 0 : i32
    %c0_i32_1 = arith.constant 0 : i32
    return %c0_i32, %c0_i32_0 : i32, i32
  }
  func.func @transform_2(%arg0: i32) -> (i32, i32) {
    %c0_i32 = arith.constant 0 : i32
    %c0_i32_0 = arith.constant 0 : i32
    %c0_i32_1 = arith.constant 0 : i32
    return %c0_i32, %c0_i32_0 : i32, i32
  }
  func.func @transform_3(%arg0: i32) -> (i32, i32) {
    %c0_i32 = arith.constant 0 : i32
    %c0_i32_0 = arith.constant 0 : i32
    %c0_i32_1 = arith.constant 0 : i32
    return %c0_i32, %c0_i32_0 : i32, i32
  }
  func.func @transform_4(%arg0: i32) -> (i32, i32) {
    %c0_i32 = arith.constant 0 : i32
    %c0_i32_0 = arith.constant 0 : i32
    %c0_i32_1 = arith.constant 0 : i32
    return %c0_i32, %c0_i32_0 : i32, i32
  }
  func.func @transform_5(%arg0: i32) -> (i32, i32) {
    %c0_i32 = arith.constant 0 : i32
    %c0_i32_0 = arith.constant 0 : i32
    return %c0_i32, %arg0 : i32, i32
  }
}

</mosaic_0001>

<bundles_post_ra>
// kernel: simple_forward.1
= control target key start
LH: loop header
LB: loop body
LE: loop exit
PB: predicated region body
PF: predicated region fallthrough
CT: control target
= control target key end

     0   :  { %vm57_vm0 = vcmask 261120   ;;  %v468_v0 = vmov 0.0|0.0   ;;  %vm469_vm2 = vmmov 0   ;;  %v470_v4 = vmov 0.0   ;;  %s615_s0 = inlined_call_operand.vmem [shape: f32[128,32], index: 0, kind: input, shape index: {}]   ;;  %s616_s2 = inlined_call_operand.vmem [shape: f32[24,1], index: 2, kind: input, shape index: {}]   ;;  %s617_s4 = inlined_call_operand.vmem [shape: f32[10,1], index: 4, kind: input, shape index: {}]   ;;  %s618_s1 = inlined_call_operand.vmem [shape: f32[24,32], index: 1, kind: input, shape index: {}]   ;;  %s619_s3 = inlined_call_operand.vmem [shape: f32[10,24], index: 3, kind: input, shape index: {}]   ;;  %s620_s5 = inlined_call_operand.vmem [shape: s32[1,128], index: 5, kind: output, shape index: {}]  }
   0x1   :  { %424 = vmatprep.subr.bf16.mxu0 %v468_v0  ;;  %v20_v1 = vld [vmem:[%s615_s0] sm:$0xff]  ;;  %v21_v2 = vld [vmem:[%s615_s0 + $0x8] sm:$0xff]  ;;  %vm510_vm1 = vmpackc.low %vm57_vm0, %vm57_vm0  ;;  %406 = vmatprep.mubr.msk.f32.mxu0 %vm469_vm2, %v470_v4  ;;  %v471_v6 = vmov 0   ;;  %vm212_vm3 = vcmask 195584   ;;  %v303_v54 = vlaneseq  ;;  %vm294_vm4 = vcmask 1041408  }
   0x2   :  { %v425_v5 = vpack.c.bf16 %v21_v2, %v20_v1  ;;  %466 = vset.pattern.permute.xlu0 %v471_v6  ;;  %467 = vset.pattern.permute.xlu1 %v471_v6  ;;  %v22_v7 = vld [vmem:[%s615_s0 + $0x10] sm:$0xff]  ;;  %v23_v8 = vld [vmem:[%s615_s0 + $0x18] sm:$0xff]  ;;  %v39_v9 = vld [vmem:[%s616_s2] sm:$0xff] }
   0x3   :  { %v429_v10 = vpack.c.bf16 %v23_v8, %v22_v7  ;;  %44 = vperm.xlu0 %466, %v39_v9   ;;  %v41_v11 = vld [vmem:[%s616_s2 + $0x10] sm:$0xff]  ;;  %v40_v12 = vld [vmem:[%s616_s2 + $0x8] sm:$0xff]  ;;  %v24_v14 = vld [vmem:[%s615_s0 + $0x20] sm:$0xff]  ;;  %v304_v62 = vshrl.u32 %v303_v54, 7 }
   0x4   :  { %427 = vmatpush3.bf16.xpose.msk.msra.mxu0 %vm510_vm1, %v425_v5  ;;  %54 = vperm.xlu1 %467, %v41_v11   ;;  %v201_v13 = vld [vmem:[%s617_s4 + $0x8] sm:$0x3]  ;;  %v200_v16 = vld [vmem:[%s617_s4] sm:$0xff]  ;;  %v26_v18 = vld [vmem:[%s615_s0 + $0x30] sm:$0xff] }
   0x5   :  { %428 = vmatprep.subr.bf16.mxu0 %v468_v0  ;;  %v25_v15 = vld [vmem:[%s615_s0 + $0x28] sm:$0xff]  ;;  %v27_v19 = vld [vmem:[%s615_s0 + $0x38] sm:$0xff]  ;;  %v28_v21 = vld [vmem:[%s615_s0 + $0x40] sm:$0xff]  ;;  %v305_v1 = vadd.s32 8, %v304_v62 }
   0x6   :  { %v433_v17 = vpack.c.bf16 %v25_v15, %v24_v14  ;;  %v437_v20 = vpack.c.bf16 %v27_v19, %v26_v18  ;;  %v29_v22 = vld [vmem:[%s615_s0 + $0x48] sm:$0xff]  ;;  %v30_v24 = vld [vmem:[%s615_s0 + $0x50] sm:$0xff]  ;;  %v31_v25 = vld [vmem:[%s615_s0 + $0x58] sm:$0xff] }
   0x7   :  { %49 = vperm.xlu0 %466, %v40_v12   ;;  %v441_v23 = vpack.c.bf16 %v29_v22, %v28_v21  ;;  %v445_v26 = vpack.c.bf16 %v31_v25, %v30_v24  ;;  %v32_v27 = vld [vmem:[%s615_s0 + $0x60] sm:$0xff]  ;;  %v33_v28 = vld [vmem:[%s615_s0 + $0x68] sm:$0xff]  ;;  %v34_v30 = vld [vmem:[%s615_s0 + $0x70] sm:$0xff]  ;;  %v307_v5 = vcvt.s32.f32 %v305_v1 }
   0x8   :  { %209 = vperm.xlu1 %467, %v201_v13   ;;  %v449_v29 = vpack.c.bf16 %v33_v28, %v32_v27  ;;  %v35_v31 = vld [vmem:[%s615_s0 + $0x78] sm:$0xff]  ;;  %v36_v33 = vld [vmem:[%s618_s1] sm:$0xff]  ;;  %v37_v34 = vld [vmem:[%s618_s1 + $0x8] sm:$0xff] }
   0x9   :  { %v453_v32 = vpack.c.bf16 %v35_v31, %v34_v30  ;;  %v38_v35 = vld [vmem:[%s618_s1 + $0x10] sm:$0xff]  ;;  %v198_v36 = vld [vmem:[%s619_s3] sm:$0xff]  ;;  %v199_v53 = vld [vmem:[%s619_s3 + $0x8] sm:$0x3]  ;;  %v311_v9 = vsub.f32 0.0, %v307_v5 }
   0xa   :  { %421 = vmatprep.mubr.msk.f32.mxu1 %vm212_vm3, %v198_v36 }
   0xb   :  { %204 = vperm.xlu0 %466, %v200_v16  }
   0xc   :  { %431 = vmatpush3.bf16.xpose.msk.msra.mxu0 %vm510_vm1, %v429_v10 }
   0xd   :  { %432 = vmatprep.subr.bf16.mxu0 %v468_v0 }
  0x14   :  { %435 = vmatpush3.bf16.xpose.msk.msra.mxu0 %vm510_vm1, %v433_v17 }
  0x15   :  { %436 = vmatprep.subr.bf16.mxu0 %v468_v0 }
  0x1c   :  { %439 = vmatpush3.bf16.xpose.msk.msra.mxu0 %vm510_vm1, %v437_v20 }
  0x1d   :  { %440 = vmatprep.subr.bf16.mxu0 %v468_v0 }
  0x24   :  { %443 = vmatpush3.bf16.xpose.msk.msra.mxu0 %vm510_vm1, %v441_v23 }
  0x25   :  { %444 = vmatprep.subr.bf16.mxu0 %v468_v0 }
  0x2c   :  { %447 = vmatpush3.bf16.xpose.msk.msra.mxu0 %vm510_vm1, %v445_v26 }
  0x2d   :  { %448 = vmatprep.subr.bf16.mxu0 %v468_v0 }
  0x34   :  { %451 = vmatpush3.bf16.xpose.msk.msra.mxu0 %vm510_vm1, %v449_v29 }
  0x35   :  { %452 = vmatprep.subr.bf16.mxu0 %v468_v0 }
  0x3c   :  { %455 = vmatpush3.bf16.xpose.msk.msra.mxu0 %vm510_vm1, %v453_v32 }
  0x43   :  { %407 = vmatmul.mubr.msk.f32.vlgmr.msra.gmra.mrb[0].mxu0 %vm57_vm0, %v36_v33 }
  0x44   :  { %409 = vmatprep.mubr.msk.f32.mxu0 %vm469_vm2, %v470_v4 }
  0x47   :  { %410 = vmatmul.mubr.msk.f32.gmra.mrb[2].mxu0 %vm57_vm0, %v37_v34 }
  0x48   :  { %412 = vmatprep.mubr.msk.f32.mxu0 %vm469_vm2, %v470_v4  ;;  %v306_v4 = vcvt.s32.f32 %v304_v62 }
  0x4a   :  { %v310_v8 = vsub.f32 0.0, %v306_v4 }
  0x4b   :  { %413 = vmatmul.mubr.msk.f32.gmra.mrb[4].mxu0 %vm57_vm0, %v38_v35 }
  0x82   :  { %v45_v37 = vpop.permute.xlu0 %44 }
  0x83   :  { %v55_v47 = vpop.permute.xlu1 %54 }
  0x86   :  { %v50_v41 = vpop.permute.xlu0 %49 }
  0x87   :  { %v210_v55 = vpop.permute.xlu1 %209 }
  0x8a   :  { %v205_v57 = vpop.permute.xlu0 %204 }
 0x116   :  { %v181_v38 = vpop.f32.mrb[0].mxu0 }
 0x117   :  { %v408_v39 = vpop.f32.mrb[1].mxu0  ;;  %v182_v40 = vadd.f32 %v181_v38, %v45_v37 }
 0x119   :  { %v195_v45 = vmax.f32 %v182_v40, 0.0 }
 0x11a   :  { %v186_v42 = vpop.f32.mrb[2].mxu0 }
 0x11b   :  { %v187_v43 = vadd.f32 %v186_v42, %v50_v41  ;;  %v411_v44 = vpop.f32.mrb[3].mxu0 }
 0x11d   :  { %v196_v46 = vmax.f32 %v187_v43, 0.0 }
 0x11e   :  { %v191_v48 = vpop.f32.mrb[4].mxu0 }
 0x11f   :  { %v192_v49 = vadd.f32 %v191_v48, %v55_v47  ;;  %v414_v50 = vpop.f32.mrb[5].mxu0  ;;  %v456_v51 = vpack.c.bf16 %v196_v46, %v195_v45 }
 0x121   :  { %v197_v52 = vmax.f32 %v192_v49, 0.0  ;;  %457 = vmatprep.subr.bf16.mxu1 %v456_v51 }
 0x122   :  { %459 = vmatpush3.bf16.msra.mxu1 %v456_v51 }
 0x123   :  { %419 = vmatprep.subr.mxu1 %v197_v52 }
 0x126   :  { %420 = vmatpush3.msra.mxu1 %v197_v52 }
 0x127   :  { %422 = vmatmul.mubr.msk.f32.vlgmr.msra.gmra.mrb[0].mxu1 %vm212_vm3, %v199_v53 }
 0x1fa   :  { %v423_v56 = vpop.f32.mrb[0].mxu1 }
 0x1fb   :  { %v291_v58 = vadd.f32 %v423_v56, %v210_v55  ;;  %v285_v59 = vpop.f32.mrb[1].mxu1 }
 0x1fc   :  { %v286_v60 = vadd.f32 %v285_v59, %v205_v57 }
 0x1fd   :  { %v295_v61 = vsel %vm294_vm4, %v291_v58, -inf }
 0x1fe   :  { %v296_v63 = vmax.f32 %v286_v60, %v295_v61 }
 0x200   :  { %v297_v0 = vrot.slane %v296_v63, 4 }
 0x202   :  { %v298_v2 = vmax.f32 %v296_v63, %v297_v0 }
 0x204   :  { %v299_v3 = vrot.slane %v298_v2, 2 }
 0x206   :  { %v300_v6 = vmax.f32 %v298_v2, %v299_v3 }
 0x208   :  { %v301_v7 = vrot.slane %v300_v6, 1 }
 0x20a   :  { %v302_v10 = vmax.f32 %v300_v6, %v301_v7 }
 0x20c   :  { %vm308_vm5 = vcmp.eq.f32.partialorder %v286_v60, %v302_v10  ;;  %vm309_vm6 = vcmp.eq.f32.partialorder %v291_v58, %v302_v10 }
 0x20d   :  { %v312_v11 = vsel %vm308_vm5, %v310_v8, -10.0  ;;  %v313_v12 = vsel %vm309_vm6, %v311_v9, -10.0 }
 0x20e   :  { %v314_v13 = vsel %vm294_vm4, %v313_v12, -inf }
 0x20f   :  { %v315_v14 = vmax.f32 %v312_v11, %v314_v13 }
 0x211   :  { %v316_v15 = vrot.slane %v315_v14, 4 }
 0x213   :  { %v317_v16 = vmax.f32 %v315_v14, %v316_v15 }
 0x215   :  { %v318_v17 = vrot.slane %v317_v16, 2 }
 0x217   :  { %v319_v18 = vmax.f32 %v317_v16, %v318_v17 }
 0x219   :  { %v320_v19 = vrot.slane %v319_v18, 1 }
 0x21b   :  { %v321_v20 = vmax.f32 %v319_v18, %v320_v19 }
 0x21d   :  { %v322_v21 = vsub.f32 0.0, %v321_v20 }
 0x21f   :  { %v460_v22 = vtrunc.f32 %v322_v21 }
 0x221   :  { %v461_v23 = vcvt.f32.s32 %v460_v22 }
 0x223   :  { %324 = vst [vmem:[%s620_s5] sm:$0x1] %v461_v23 }

</bundles_post_ra>
